<compile_context>
chip_gen: v7x
topology: tpu7x:2x2x1
jax: 0.10.0
libtpu: 0.0.40
codegen_flags: <defaults>
</compile_context>

<pallas_src>
import math

import jax
import jax.numpy as jnp
from jax.experimental import pallas as pl
from jax.experimental.pallas import tpu as pltpu


def make_pos_encoding(seq_length: int, d_model: int) -> jnp.ndarray:
    """Replicates the buffer built in PositionalEncoding.__init__ (shape (S, D))."""
    pos = jnp.arange(seq_length, dtype=jnp.float32)[:, None]                       # (S, 1)
    denom = jnp.exp(
        jnp.arange(0, d_model, 2, dtype=jnp.float32) * (-math.log(10000.0) / d_model)
    )                                                                               # (D/2,)
    pe = jnp.zeros((seq_length, d_model), dtype=jnp.float32)
    pe = pe.at[:, 0::2].set(jnp.sin(pos * denom))
    pe = pe.at[:, 1::2].set(jnp.cos(pos * denom))
    return pe


def _posenc_kernel(x_ref, pe_ref, o_ref):
    # x_ref / o_ref: (TS, D) tile of batch element b, seq tile s (batch dim squeezed)
    # pe_ref:        (TS, D) positional-encoding tile (resident across the batch loop)
    o_ref[...] = x_ref[...] + pe_ref[...]


def _posenc_dropout_kernel(x_ref, pe_ref, mask_ref, o_ref):
    # mask_ref holds 0 or 1/(1-p) in x.dtype -> inverted-dropout in one multiply.
    o_ref[...] = (x_ref[...] + pe_ref[...]) * mask_ref[...]


def _choose_seq_tile(S: int, D: int, itemsize: int, target_bytes: int = 1 << 20) -> int:
    """Largest multiple-of-8 seq tile <= ~target_bytes per block that divides S."""
    if S <= 8:
        return S
    max_ts = (target_bytes // max(1, D * itemsize)) // 8 * 8
    max_ts = max(8, min(S, max_ts))
    ts = max_ts
    while ts >= 8:
        if S % ts == 0:
            return ts
        ts -= 8
    return S  # fallback: full sequence as one block


def positional_encoding_forward(x, pos_encoding, *, dropout_p: float,
                                rng_key=None, training: bool = True):
    """x: (B, S, D); pos_encoding: (seq_length, D) with seq_length >= S."""
    B, S, D = x.shape
    pe = pos_encoding[:S, :].astype(x.dtype)   # == self.pos_encoding[:, :X.shape[1], :]

    itemsize = jnp.dtype(x.dtype).itemsize
    TS = _choose_seq_tile(S, D, itemsize)
    num_s = S // TS

    # Batch-squeezed (TS, D) tiles for x / mask / out; (TS, D) tile for pe.
    xy_spec = pl.BlockSpec((None, TS, D), lambda s, b: (b, s, 0))
    pe_spec = pl.BlockSpec((TS, D), lambda s, b: (s, 0))

    use_dropout = training and float(dropout_p) > 0.0
    if use_dropout:
        if rng_key is None:
            rng_key = jax.random.PRNGKey(0)
        keep = jax.random.bernoulli(rng_key, p=1.0 - float(dropout_p), shape=x.shape)
        mask = keep.astype(x.dtype) * jnp.asarray(1.0 / (1.0 - float(dropout_p)), x.dtype)
        kernel = _posenc_dropout_kernel
        in_specs = [xy_spec, pe_spec, xy_spec]
        args = (x, pe, mask)
    else:
        kernel = _posenc_kernel
        in_specs = [xy_spec, pe_spec]
        args = (x, pe)

    # VMEM budget: every blocked operand (inputs + output) is double-buffered.
    blk_bytes = TS * D * itemsize
    n_blocked = len(args) + 1
    vmem_limit = min(max(4 * n_blocked * blk_bytes, 16 << 20), 48 << 20)

    return pl.pallas_call(
        kernel,
        out_shape=jax.ShapeDtypeStruct((B, S, D), x.dtype),
        grid_spec=pltpu.PrefetchScalarGridSpec(
            num_scalar_prefetch=0,
            grid=(num_s, B),          # seq tiles outer, batch inner -> pe stays resident
            in_specs=in_specs,
            out_specs=xy_spec,
        ),
        compiler_params=pltpu.CompilerParams(
            dimension_semantics=("parallel", "parallel"),
            vmem_limit_bytes=vmem_limit,
        ),
    )(*args)


if __name__ == "__main__":
    # Module hyper-parameters (deterministic, in-script, lane-dense d_model).
    d_model = 128
    seq_length = 16
    dropout = 0.1
    batch = 4

    key = jax.random.PRNGKey(0)
    k_x, k_drop = jax.random.split(key)
    x = jax.random.normal(k_x, (batch, seq_length, d_model), dtype=jnp.float32)

    pos_encoding = make_pos_encoding(seq_length, d_model)

    # Eval path (identity dropout): exact check of the positional add.
    y_eval = positional_encoding_forward(x, pos_encoding, dropout_p=dropout, training=False)
    y_eval = jax.block_until_ready(y_eval)
    ref = x + pos_encoding[None, :seq_length, :]
    assert jnp.allclose(y_eval, ref, atol=1e-6), "positional-encoding add mismatch"

    # Training path: every element must be either dropped (0) or scaled by 1/(1-p).
    y_train = positional_encoding_forward(
        x, pos_encoding, dropout_p=dropout, rng_key=k_drop, training=True)
    y_train = jax.block_until_ready(y_train)
    assert y_train.shape == (batch, seq_length, d_model)
    scaled_ref = ref / (1.0 - dropout)
    valid = jnp.isclose(y_train, 0.0, atol=1e-6) | jnp.isclose(y_train, scaled_ref, atol=1e-5)
    assert bool(jnp.all(valid)), "dropout output mismatch"

    print("KERNEL_OK")
</pallas_src>

<mosaic_0001>
module attributes {stable_mosaic.version = 11 : i64} {
  func.func @_posenc_kernel(%arg0: i32, %arg1: i32, %arg2: memref<1x16x128xf32, #tpu.memory_space<vmem>>, %arg3: memref<16x128xf32, #tpu.memory_space<vmem>>, %arg4: memref<1x16x128xf32, #tpu.memory_space<vmem>>) attributes {dimension_semantics = [#tpu.dimension_semantics<parallel>, #tpu.dimension_semantics<parallel>], iteration_bounds = array<i64: 1, 4>, scalar_prefetch = 0 : i64, scratch_operands = 0 : i64, tpu.core_type = #tpu.core_type<tc>, window_params = [{transform_indices = @transform_0, window_bounds = array<i64: 1, 16, 128>}, {transform_indices = @transform_1, window_bounds = array<i64: 16, 128>}, {transform_indices = @transform_2, window_bounds = array<i64: 1, 16, 128>}]} {
    %c0 = arith.constant 0 : index
    %c0_0 = arith.constant 0 : index
    %c0_1 = arith.constant 0 : index
    %0 = vector.load %arg2[%c0, %c0_0, %c0_1] : memref<1x16x128xf32, #tpu.memory_space<vmem>>, vector<1x16x128xf32>
    %1 = vector.shape_cast %0 : vector<1x16x128xf32> to vector<16x128xf32>
    %c0_2 = arith.constant 0 : index
    %c0_3 = arith.constant 0 : index
    %2 = vector.load %arg3[%c0_2, %c0_3] : memref<16x128xf32, #tpu.memory_space<vmem>>, vector<16x128xf32>
    %3 = arith.addf %1, %2 : vector<16x128xf32>
    %c0_4 = arith.constant 0 : index
    %c0_5 = arith.constant 0 : index
    %c0_6 = arith.constant 0 : index
    %4 = vector.load %arg4[%c0_4, %c0_5, %c0_6] : memref<1x16x128xf32, #tpu.memory_space<vmem>>, vector<1x16x128xf32>
    %5 = vector.shape_cast %4 : vector<1x16x128xf32> to vector<16x128xf32>
    %6 = vector.shape_cast %3 : vector<16x128xf32> to vector<1x16x128xf32>
    tpu.vector_store %arg4[%c0_4, %c0_5, %c0_6], %6 {strides = array<i32>} : memref<1x16x128xf32, #tpu.memory_space<vmem>>, vector<1x16x128xf32>,
    return
  }
  func.func @transform_0(%arg0: i32, %arg1: i32) -> (i32, i32, i32) {
    %c0_i32 = arith.constant 0 : i32
    %c0_i32_0 = arith.constant 0 : i32
    return %arg1, %arg0, %c0_i32 : i32, i32, i32
  }
  func.func @transform_1(%arg0: i32, %arg1: i32) -> (i32, i32) {
    %c0_i32 = arith.constant 0 : i32
    %c0_i32_0 = arith.constant 0 : i32
    return %arg0, %c0_i32 : i32, i32
  }
  func.func @transform_2(%arg0: i32, %arg1: i32) -> (i32, i32, i32) {
    %c0_i32 = arith.constant 0 : i32
    %c0_i32_0 = arith.constant 0 : i32
    return %arg1, %arg0, %c0_i32 : i32, i32, i32
  }
}

</mosaic_0001>

<bundles_post_ra>
// kernel: tpu_custom_call.1
= control target key start
LH: loop header
LB: loop body
LE: loop exit
PB: predicated region body
PF: predicated region fallthrough
CT: control target
= control target key end

     0   :  { %7 = vsyncpa [#allocation3], 0  ;;  %s816_s0 = inlined_call_operand.hbm [shape: f32[4,16,128], index: 0, kind: input, shape index: {}]   ;;  %s817_s1 = inlined_call_operand.hbm [shape: f32[16,128], index: 1, kind: input, shape index: {}]   ;;  %s818_s2 = inlined_call_operand.hbm [shape: f32[4,16,128], index: 2, kind: output, shape index: {}]  }
   0x1   :  { %9 = vsyncpa [#allocation3 + $0x1], 0 }
   0x2   :  { %10 = vsyncpa [#allocation6], 0 }
   0x3   :  { %11 = vsyncpa [#allocation4], 0 }
   0x4   :  { %13 = vsyncpa [#allocation4 + $0x1], 0  ;;  %s593_s9 = smov 0   ;;  %s595_s10 = smov 0  }
   0x5   :  { %s597_s11 = smov 0   ;;  %s599_s12 = smov 0  }
   0x6   :  { %s601_s13 = smov 0   ;;  %s603_s14 = smov 0  }
   0x7 LB: > { %s329_s15 = sadd.s32 4294967295, %s569_s14   ;;  %s330_s16 = sadd.s32 4294967294, %s569_s14   ;;  %s569_s14 = sphi %s603_s14, %s19_s14   ;;  %s565_s13 = sphi %s601_s13, %s841_s13   ;;  %s561_s12 = sphi %s599_s12, %s840_s12   ;;  %s557_s11 = sphi %s597_s11, %s839_s11   ;;  %s553_s10 = sphi %s595_s10, %s838_s10   ;;  %s549_s9 = sphi %s593_s9, %s837_s9  }
   0x8   : > { %p53_p0 = scmp.ne.s32.totalorder %s553_s10, %s549_s9  ;;  %p627_p1 = scmp.eq.s32.totalorder %s329_s15, 0 }
   0x9   : > { %p631_p2 = scmp.eq.s32.totalorder %s329_s15, 3  ;;  %p111_p3 = scmp.eq.s32.totalorder %s330_s16, 3 }
   0xa   : > { %s823_s17 = scalar_select %p627_p1, 1, 0 }
   0xb   : > { %s824_s18 = scalar_select %p631_p2, 1, 0 }
   0xc   : > { %p637_p4 = por %p627_p1, %p53_p0  ;;  %p331_p5 = scmp.ge.s32.totalorder %s569_s14, 1 }
   0xd   : > { %p642_p6 = por %p111_p3, %p53_p0  ;;  %p118_p7 = scmp.lt.s32.totalorder %s569_s14, 5 }
   0xe   : > { %s825_s19 = scalar_select %p637_p4, 1, 0 }
   0xf   : > { %s826_s20 = scalar_select %p642_p6, 1, 0 }
  0x10   : > { %p647_p8 = pnand %p331_p5, %p118_p7  ;;  %s571_s22 = smov [#allocation5]  }
  0x11   : > { %s133_s23 = sshll.u32 %s571_s22, 4  ;;  %s28_s25 = sadd.s32 1, %s565_s13  ;;  %s134_s23 = int_to_ptr.vmem [resolvable:$true] %s133_s23 }
  0x12   : > { %s827_s21 = scalar_select %p647_p8, 1, 0 }
  0x13   : > { %p356_p9 = pneg %p647_p8  ;;  %s425_s28 = scalar_lea.hbm %s817_s1, 256 }
  0x14   : > { %p426_p11 = scmp.ne.s32.totalorder %s817_s1, %s425_s28  ;;  %p432_p3 = scmp.lt.u32.totalorder %s425_s28, %s817_s1 }
  0x15   : > { %p655_p10 = pnand %p356_p9, %p627_p1 }
  0x17   : > { %p427_p12 = pneg %p655_p10 }
  0x19   : > { %p428_p13 = pnand %p427_p12, %p426_p11 }
  0x1b   : > { %p429_p0 = pneg %p428_p13 }
  0x1d   : > { %p434_p5 = pnand %p432_p3, %p429_p0 }
  0x1f   : > { %437 = shalt.err (!%p434_p5)
}
  0x20   : > { %s438_s5 = scalar_lea.vmem %s134_s23, 256  ;;  %p446_p1 = scmp.lt.s32.totalorder %s134_s23, %s134_s23 }
  0x21   : > { %p439_p7 = scmp.ne.s32.totalorder %s134_s23, %s438_s5  ;;  %p447_p4 = scmp.lt.s32.totalorder %s438_s5, %s438_s5 }
  0x23   : > { %p441_p9 = pnand %p439_p7, %p427_p12  ;;  %p448_p8 = por %p447_p4, %p446_p1 }
  0x25   : > { %p442_p6 = pneg %p441_p9 }
  0x27   : > { %p449_p2 = pnand %p448_p8, %p442_p6 }
  0x29   : > { %452 = shalt.err (!%p449_p2)
}
  0x2a   : > { %s572_s6 = smov 128   ;;  %s573_s7 = smov 8  }
  0x2b   : > { %359 = dma.hbm_to_vmem [thread:$0]  (!%p655_p10), %s817_s1, 256, %s134_s23, [#allocation6], %s572_s6, %s572_s6, %s573_s7  }
  0x2c   : > { %p29_p1 = scmp.ge.s32.totalorder %s28_s25, 4  ;;  %s40_s16 = sadd.s32 1, %s557_s11 }
  0x2d   : > { %p47_p2 = scmp.ne.s32.totalorder %s557_s11, %s553_s10  ;;  %p48_p4 = scmp.eq.s32.totalorder %s569_s14, 0 }
  0x2e   : > { %s843_s25 = smov (%p29_p1, %s28_s25), 0  ;;  %p830_p8 = scmp.ne.s32.totalorder %s824_s18, 0 }
  0x2f   : > { %p685_p6 = por %p48_p4, %p47_p2  ;;  %s35_s26 = ssub.s32 %s565_s13, %s843_s25 }
  0x30   : > { %p691_p11 = por %p830_p8, %p47_p2  ;;  %p369_p12 = scmp.lt.s32.totalorder %s569_s14, 4 }
  0x31   : > { %p38_p10 = scmp.eq.s32.totalorder %s35_s26, 0  ;;  %s147_s23 = sand.u32 1, %s557_s11  }
  0x32   : > { %s334_s27 = sshll.u32 %s147_s23, 4  ;;  %s346_s29 = sshll.u32 %s565_s13, 8 }
  0x33   : > { %s700_s28 = scalar_select %p38_p10, %s557_s11, %s40_s16  }
  0x34   : > { %s706_s4 = scalar_lea.hbm %s816_s0, %s346_s29  ;;  %s151_s18 = scalar_lea.vmem [#allocation2], %s334_s27 }
  0x35   : > { %s160_s5 = sshll.u32 %s151_s18, 4  ;;  %p712_p13 = pnand %p369_p12, %p685_p6  ;;  %s708_s5 = int_to_ptr.vmem [resolvable:$true] %s160_s5 }
  0x36   : > { %s716_s15 = scalar_lea.sflag [#allocation3], %s147_s23  ;;  %s453_s16 = scalar_lea.hbm %s706_s4, 256 }
  0x37   : > { %p454_p0 = scmp.ne.s32.totalorder %s706_s4, %s453_s16  ;;  %p455_p3 = pneg %p712_p13 }
  0x38   : > { %s458_s22 = scalar_lea.hbm %s816_s0, 1024  ;;  %p459_p9 = scmp.lt.u32.totalorder %s706_s4, %s816_s0 }
  0x39   : > { %p456_p5 = pnand %p455_p3, %p454_p0  ;;  %p460_p1 = scmp.lt.u32.totalorder %s458_s22, %s453_s16 }
  0x3a   : > { %p462_p4 = scmp.lt.u32.totalorder %s453_s16, %s706_s4 }
  0x3b   : > { %p457_p7 = pneg %p456_p5  ;;  %p461_p2 = por %p460_p1, %p459_p9 }
  0x3d   : > { %p463_p6 = por %p462_p4, %p461_p2 }
  0x3f   : > { %p464_p8 = pnand %p463_p6, %p457_p7 }
  0x41   : > { %467 = shalt.err (!%p464_p8)
}
  0x42   : > { %s468_s23 = scalar_lea.vmem %s708_s5, 256  ;;  %s574_s3 = smov [#allocation2]  }
  0x43   : > { %p469_p12 = scmp.ne.s32.totalorder %s708_s5, %s468_s23  ;;  %s473_s18 = sshll.u32 %s574_s3, 4  ;;  %s474_s18 = int_to_ptr.vmem [resolvable:$false] %s473_s18 }
  0x44   : > { %s475_s26 = scalar_lea.vmem %s474_s18, 512  ;;  %p476_p5 = scmp.lt.s32.totalorder %s708_s5, %s474_s18 }
  0x45   : > { %p471_p10 = pnand %p469_p12, %p455_p3  ;;  %p477_p9 = scmp.lt.s32.totalorder %s475_s26, %s468_s23 }
  0x47   : > { %p472_p0 = pneg %p471_p10  ;;  %p478_p1 = por %p477_p9, %p476_p5 }
  0x49   : > { %p479_p2 = pnand %p478_p1, %p472_p0 }
  0x4b   : > { %482 = shalt.err (!%p479_p2)
}
  0x4c   : > { %363 = dma.hbm_to_vmem [thread:$0]  (!%p712_p13), %s706_s4, 256, %s708_s5, %s716_s15, %s572_s6, %s572_s6, %s573_s7  }
  0x4d   : > { %p833_p3 = scmp.ne.s32.totalorder %s827_s21, 0 }
  0x4e   : > { %s750_s16 = sand.u32 (!%p833_p3), 1, %s553_s10   ;;  %p834_p7 = scmp.ne.s32.totalorder (!%p833_p3), %s825_s19, 0 }
  0x4f   : > { %172 = sbr.rel (%p833_p3) target bundleno = 116 (0x74), region = 28  ;;  %s338_s27 = sshll.u32 (!%p833_p3), %s750_s16, 4 }
  0x50   : > { %s175_s22 = scalar_lea.sflag (!%p833_p3), [#allocation3], %s750_s16  ;;  %s178_s29 = scalar_lea.vmem (!%p833_p3), [#allocation2], %s338_s27 }
  0x56   : > { %536 = dma.done.wait (%p834_p7), %s175_s22, 256  }
  0x57   : > { %538 = vsyncadd (%p834_p7), %s175_s22, 4294967040  ;;  %p835_p4 = scmp.ne.s32.totalorder %s823_s17, 0 }
  0x59   : > { %540 = dma.done.wait (%p835_p4), [#allocation6], 256  }
  0x5a   : > { %542 = vsyncadd (%p835_p4), [#allocation6], 4294967040  ;;  %s202_s21 = scalar_lea.vmem [#allocation7], %s338_s27  ;;  %s347_s7 = sshll.u32 %s561_s12, 8  ;;  %v206_v0 = vld [vmem:[%s178_s29] sm:$0xff]  ;;  %v207_v2 = vld [vmem:[%s178_s29 + $0x8] sm:$0xff] }
  0x5b   : > { %s230_s6 = sshll.u32 %s202_s21, 4  ;;  %v208_v1 = vld [vmem:[#allocation5] sm:$0xff]  ;;  %v209_v4 = vld [vmem:[#allocation5 + $0x8] sm:$0xff]  ;;  %s768_s17 = scalar_lea.hbm %s818_s2, %s347_s7  ;;  %s763_s6 = int_to_ptr.vmem [resolvable:$true] %s230_s6 }
  0x5c   : > { %v210_v3 = vadd.f32 %v208_v1, %v206_v0  ;;  %v211_v5 = vadd.f32 %v209_v4, %v207_v2  ;;  %s215_s5 = scalar_lea.sflag [#allocation4], %s750_s16  ;;  %s483_s12 = scalar_lea.vmem %s763_s6, 256 }
  0x5d   : > { %p484_p13 = scmp.ne.s32.totalorder %s763_s6, %s483_s12  ;;  %s575_s8 = smov [#allocation7]  }
  0x5e   : > { %212 = vst [vmem:[%s202_s21] sm:$0xff] %v210_v3  ;;  %213 = vst [vmem:[%s202_s21 + $0x8] sm:$0xff] %v211_v5  ;;  %s487_s15 = sshll.u32 %s575_s8, 4  ;;  %s488_s15 = int_to_ptr.vmem [resolvable:$false] %s487_s15 }
  0x5f   : > { %p485_p6 = pnand %p484_p13, %p691_p11  ;;  %s489_s30 = scalar_lea.vmem %s488_s15, 512 }
  0x60   : > { %p490_p12 = scmp.lt.s32.totalorder %s763_s6, %s488_s15  ;;  %p491_p10 = scmp.lt.s32.totalorder %s489_s30, %s483_s12 }
  0x61   : > { %p486_p8 = pneg %p485_p6 }
  0x62   : > { %p492_p0 = por %p491_p10, %p490_p12 }
  0x64   : > { %p493_p5 = pnand %p492_p0, %p486_p8 }
  0x66   : > { %496 = shalt.err (!%p493_p5)
}
  0x67   : > { %s497_s23 = scalar_lea.hbm %s768_s17, 256  ;;  %s501_s26 = scalar_lea.hbm %s818_s2, 1024 }
  0x68   : > { %p498_p9 = scmp.ne.s32.totalorder %s768_s17, %s497_s23  ;;  %p502_p3 = scmp.lt.u32.totalorder %s768_s17, %s818_s2 }
  0x69   : > { %p503_p7 = scmp.lt.u32.totalorder %s501_s26, %s497_s23  ;;  %p505_p13 = scmp.lt.u32.totalorder %s497_s23, %s768_s17 }
  0x6a   : > { %p499_p1 = pnand %p498_p9, %p691_p11 }
  0x6b   : > { %p504_p4 = por %p503_p7, %p502_p3 }
  0x6c   : > { %p500_p2 = pneg %p499_p1 }
  0x6d   : > { %p506_p6 = por %p505_p13, %p504_p4 }
  0x6f   : > { %p507_p8 = pnand %p506_p6, %p500_p2 }
  0x71   : > { %510 = shalt.err (!%p507_p8)
}
  0x72   : > { %s576_s29 = smov 128   ;;  %s577_s21 = smov 8  }
  0x73   : > { %354 = dma.vmem_to_hbm [thread:$0]  (%p691_p11), %s763_s6, 256, %s768_s17, %s215_s5, %s576_s29, %s576_s29, %s577_s21  }
  0x74 PF: > { %p371_p12 = scmp.ge.s32.totalorder %s569_s14, 2  ;;  %s245_s7 = sand.u32 1, %s549_s9  }
  0x75   : > { %p836_p10 = scmp.ne.s32.totalorder %s826_s20, 0  ;;  %s246_s19 = scalar_lea.sflag [#allocation4], %s245_s7 }
  0x77   : > { %p365_p0 = pnand %p371_p12, %p836_p10 }
  0x79   : > { %544 = dma.done.wait (!%p365_p0), %s246_s19, 256  }
  0x7a   : > { %546 = vsyncadd (!%p365_p0), %s246_s19, 4294967040  ;;  %s19_s14 = sadd.s32 1, %s569_s14   ;;  %s837_s9 = smov %s553_s10 }
  0x7b   : > { %p16_p5 = scmp.ge.s32.totalorder %s19_s14, 6   ;;  %s838_s10 = smov %s557_s11 }
  0x7c   : > { %s839_s11 = smov %s700_s28  ;;  %s840_s12 = smov %s565_s13 }
  0x7d   : > { %s841_s13 = smov %s843_s25  ;;  %18 = sbr.rel (!%p16_p5) target bundleno = 7 (0x7), region = 78 }
  0x84   :  { %251 = vsyncpa [#allocation3], 1 }
  0x85   :  { %253 = vsyncpa [#allocation3 + $0x1], 1 }
  0x86   :  { %254 = vsyncpa [#allocation6], 1 }
  0x87   :  { %255 = vsyncpa [#allocation4], 1 }
  0x88   :  { %257 = vsyncpa [#allocation4 + $0x1], 1 }

</bundles_post_ra>
